<compile_context>
chip_gen: v5e
topology: v5e:2x2
jax: 0.10.0
libtpu: 0.0.40
codegen_flags: <defaults>
</compile_context>

<pallas_src>
import functools

import jax
import jax.numpy as jnp
from jax.experimental import pallas as pl
from jax.experimental.pallas import tpu as pltpu


def bow_block_kernel(att_ref, x_ref, wfc_ref, bfc_ref, wpr_ref, bpr_ref, o_ref):
    """One grid step handles one batch element.

    att_ref: (T, T)   shared causal-average matrix (row t: 1/(t+1) on cols 0..t)
    x_ref:   (T, C)   this batch's activations (batch dim squeezed by BlockSpec)
    wfc_ref: (C, H), bfc_ref: (1, H)   c_fc weight (pre-transposed) / bias
    wpr_ref: (H, C), bpr_ref: (1, C)   c_proj weight (pre-transposed) / bias
    o_ref:   (T, C)
    """
    x = x_ref[...]  # f32

    # Causal bag-of-words on the MXU, residual on the VPU (exact add).
    y = jnp.dot(att_ref[...], x, preferred_element_type=jnp.float32)
    x1 = x + y

    # MLP with residual: x1 + c_proj(tanh(c_fc(x1)))
    h = jnp.tanh(
        jnp.dot(x1, wfc_ref[...], preferred_element_type=jnp.float32) + bfc_ref[...]
    )
    mlp = jnp.dot(h, wpr_ref[...], preferred_element_type=jnp.float32) + bpr_ref[...]

    o_ref[...] = (x1 + mlp).astype(o_ref.dtype)


def init_bow_block_params(key, T, C, H):
    """Parameter-init-time work: weights, pre-transposed copies, BoW constant.

    Returns (kernel_params, torch_layout_params).  Everything the kernel needs
    is built exactly once here (nothing re-materialized per call).
    """
    k1, k2, k3, k4 = jax.random.split(key, 4)
    # Deterministic "nn.Linear"-style init, PyTorch layout: weight (out, in).
    w_fc = jax.random.uniform(k1, (H, C), jnp.float32, -1.0, 1.0) / jnp.sqrt(C)
    b_fc = jax.random.uniform(k2, (H,), jnp.float32, -1.0, 1.0) / jnp.sqrt(C)
    w_proj = jax.random.uniform(k3, (C, H), jnp.float32, -1.0, 1.0) / jnp.sqrt(H)
    b_proj = jax.random.uniform(k4, (C,), jnp.float32, -1.0, 1.0) / jnp.sqrt(H)

    # Shared (T, T) causal-average matrix == softmax of the 0/-inf masked att.
    att = jnp.tril(jnp.ones((T, T), jnp.float32)) / jnp.arange(
        1, T + 1, dtype=jnp.float32
    )[:, None]

    kernel_params = dict(
        att=att,
        w_fc_t=jnp.asarray(w_fc.T),        # (C, H)
        b_fc2=b_fc.reshape(1, H),          # (1, H)
        w_proj_t=jnp.asarray(w_proj.T),    # (H, C)
        b_proj2=b_proj.reshape(1, C),      # (1, C)
    )
    torch_layout = dict(w_fc=w_fc, b_fc=b_fc, w_proj=w_proj, b_proj=b_proj)
    return kernel_params, torch_layout


@jax.jit
def bow_block(x, att, w_fc_t, b_fc2, w_proj_t, b_proj2):
    """x: (B, T, C) f32.  All other args precomputed by init_bow_block_params."""
    B, T, C = x.shape
    H = w_fc_t.shape[1]

    cost = pl.CostEstimate(
        flops=2 * B * (T * T * C + T * C * H + T * H * C),
        transcendentals=B * T * H,
        bytes_accessed=4 * (2 * B * T * C + T * T + C * H + H + H * C + C),
    )

    return pl.pallas_call(
        bow_block_kernel,
        out_shape=jax.ShapeDtypeStruct((B, T, C), x.dtype),
        grid=(B,),
        in_specs=[
            pl.BlockSpec((T, T), lambda b: (0, 0)),          # shared BoW matrix
            pl.BlockSpec((None, T, C), lambda b: (b, 0, 0)),  # per-batch x
            pl.BlockSpec((C, H), lambda b: (0, 0)),
            pl.BlockSpec((1, H), lambda b: (0, 0)),
            pl.BlockSpec((H, C), lambda b: (0, 0)),
            pl.BlockSpec((1, C), lambda b: (0, 0)),
        ],
        out_specs=pl.BlockSpec((None, T, C), lambda b: (b, 0, 0)),
        compiler_params=pltpu.CompilerParams(
            dimension_semantics=("parallel",),   # 2 TCs on v7x; no-op on v5e/v6e
            vmem_limit_bytes=32 << 20,           # explicit (v5e default is 16 MiB)
        ),
        cost_estimate=cost,
    )(att, x, w_fc_t, b_fc2, w_proj_t, b_proj2)


def bow_block_ref(x, w_fc, b_fc, w_proj, b_proj):
    """Pure-JAX reference mirroring the PyTorch forward (PyTorch weight layout)."""
    B, T, C = x.shape
    mask = jnp.tril(jnp.ones((T, T), jnp.float32))
    att = jnp.where(mask == 0, -jnp.inf, 0.0)
    att = jax.nn.softmax(att, axis=-1)  # (T, T) uniform causal averages
    y = jnp.einsum("tk,bkc->btc", att, x)
    x1 = x + y
    h = jnp.tanh(x1 @ w_fc.T + b_fc)
    return x1 + h @ w_proj.T + b_proj


if __name__ == "__main__":
    # config: block_size = T = 8, n_embd = 32, n_embd2 = 64, batch = 2
    B, T, C, H = 2, 8, 32, 64

    key = jax.random.PRNGKey(0)
    kx, kp = jax.random.split(key)

    x = jax.random.normal(kx, (B, T, C), jnp.float32)
    params, torch_params = init_bow_block_params(kp, T, C, H)

    out = bow_block(
        x,
        params["att"],
        params["w_fc_t"],
        params["b_fc2"],
        params["w_proj_t"],
        params["b_proj2"],
    )
    out = jax.block_until_ready(out)

    ref = bow_block_ref(
        x,
        torch_params["w_fc"],
        torch_params["b_fc"],
        torch_params["w_proj"],
        torch_params["b_proj"],
    )
    assert out.shape == (B, T, C)
    assert jnp.allclose(out, ref, atol=1e-5, rtol=1e-5), "mismatch vs reference"

    print("KERNEL_OK")
</pallas_src>

<mosaic_0001>
module attributes {stable_mosaic.version = 11 : i64} {
  func.func @bow_block_kernel(%arg0: i32, %arg1: memref<8x8xf32, #tpu.memory_space<vmem>>, %arg2: memref<1x8x32xf32, #tpu.memory_space<vmem>>, %arg3: memref<32x64xf32, #tpu.memory_space<vmem>>, %arg4: memref<1x64xf32, #tpu.memory_space<vmem>>, %arg5: memref<64x32xf32, #tpu.memory_space<vmem>>, %arg6: memref<1x32xf32, #tpu.memory_space<vmem>>, %arg7: memref<1x8x32xf32, #tpu.memory_space<vmem>>) attributes {dimension_semantics = [#tpu.dimension_semantics<parallel>], iteration_bounds = array<i64: 2>, scalar_prefetch = 0 : i64, scratch_operands = 0 : i64, tpu.core_type = #tpu.core_type<tc>, window_params = [{pipeline_mode = #tpu.pipeline_mode<synchronous>, transform_indices = @transform_0, window_bounds = array<i64: 8, 8>}, {transform_indices = @transform_1, window_bounds = array<i64: 1, 8, 32>}, {pipeline_mode = #tpu.pipeline_mode<synchronous>, transform_indices = @transform_2, window_bounds = array<i64: 32, 64>}, {pipeline_mode = #tpu.pipeline_mode<synchronous>, transform_indices = @transform_3, window_bounds = array<i64: 1, 64>}, {pipeline_mode = #tpu.pipeline_mode<synchronous>, transform_indices = @transform_4, window_bounds = array<i64: 64, 32>}, {pipeline_mode = #tpu.pipeline_mode<synchronous>, transform_indices = @transform_5, window_bounds = array<i64: 1, 32>}, {transform_indices = @transform_6, window_bounds = array<i64: 1, 8, 32>}]} {
    %c0 = arith.constant 0 : index
    %c0_0 = arith.constant 0 : index
    %c0_1 = arith.constant 0 : index
    %0 = vector.load %arg2[%c0, %c0_0, %c0_1] : memref<1x8x32xf32, #tpu.memory_space<vmem>>, vector<1x8x32xf32>
    %1 = vector.shape_cast %0 : vector<1x8x32xf32> to vector<8x32xf32>
    %c0_2 = arith.constant 0 : index
    %c0_3 = arith.constant 0 : index
    %2 = vector.load %arg1[%c0_2, %c0_3] : memref<8x8xf32, #tpu.memory_space<vmem>>, vector<8x8xf32>
    %cst = arith.constant dense<0.000000e+00> : vector<8x32xf32>
    %3 = tpu.matmul %2, %1, %cst {dimension_numbers = #tpu.dot_dimension_numbers<[1], [0], [0], [1], [0, 0, 1, 1], [], []>} : vector<8x8xf32>, vector<8x32xf32>, vector<8x32xf32> -> vector<8x32xf32>
    %4 = arith.addf %1, %3 : vector<8x32xf32>
    %c0_4 = arith.constant 0 : index
    %c0_5 = arith.constant 0 : index
    %5 = vector.load %arg3[%c0_4, %c0_5] : memref<32x64xf32, #tpu.memory_space<vmem>>, vector<32x64xf32>
    %cst_6 = arith.constant dense<0.000000e+00> : vector<8x64xf32>
    %6 = tpu.matmul %4, %5, %cst_6 {dimension_numbers = #tpu.dot_dimension_numbers<[1], [0], [0], [1], [0, 0, 1, 1], [], []>} : vector<8x32xf32>, vector<32x64xf32>, vector<8x64xf32> -> vector<8x64xf32>
    %c0_7 = arith.constant 0 : index
    %c0_8 = arith.constant 0 : index
    %7 = vector.load %arg4[%c0_7, %c0_8] : memref<1x64xf32, #tpu.memory_space<vmem>>, vector<1x64xf32>
    %8 = vector.broadcast %7 : vector<1x64xf32> to vector<8x64xf32>
    %9 = arith.addf %6, %8 : vector<8x64xf32>
    %10 = math.tanh %9 : vector<8x64xf32>
    %c0_9 = arith.constant 0 : index
    %c0_10 = arith.constant 0 : index
    %11 = vector.load %arg5[%c0_9, %c0_10] : memref<64x32xf32, #tpu.memory_space<vmem>>, vector<64x32xf32>
    %cst_11 = arith.constant dense<0.000000e+00> : vector<8x32xf32>
    %12 = tpu.matmul %10, %11, %cst_11 {dimension_numbers = #tpu.dot_dimension_numbers<[1], [0], [0], [1], [0, 0, 1, 1], [], []>} : vector<8x64xf32>, vector<64x32xf32>, vector<8x32xf32> -> vector<8x32xf32>
    %c0_12 = arith.constant 0 : index
    %c0_13 = arith.constant 0 : index
    %13 = vector.load %arg6[%c0_12, %c0_13] : memref<1x32xf32, #tpu.memory_space<vmem>>, vector<1x32xf32>
    %14 = vector.broadcast %13 : vector<1x32xf32> to vector<8x32xf32>
    %15 = arith.addf %12, %14 : vector<8x32xf32>
    %16 = arith.addf %4, %15 : vector<8x32xf32>
    %c0_14 = arith.constant 0 : index
    %c0_15 = arith.constant 0 : index
    %c0_16 = arith.constant 0 : index
    %17 = vector.load %arg7[%c0_14, %c0_15, %c0_16] : memref<1x8x32xf32, #tpu.memory_space<vmem>>, vector<1x8x32xf32>
    %18 = vector.shape_cast %17 : vector<1x8x32xf32> to vector<8x32xf32>
    %19 = vector.shape_cast %16 : vector<8x32xf32> to vector<1x8x32xf32>
    tpu.vector_store %arg7[%c0_14, %c0_15, %c0_16], %19 {strides = array<i32>} : memref<1x8x32xf32, #tpu.memory_space<vmem>>, vector<1x8x32xf32>,
    return
  }
  func.func @transform_0(%arg0: i32) -> (i32, i32) {
    %c0_i32 = arith.constant 0 : i32
    %c0_i32_0 = arith.constant 0 : i32
    %c0_i32_1 = arith.constant 0 : i32
    return %c0_i32, %c0_i32_0 : i32, i32
  }
  func.func @transform_1(%arg0: i32) -> (i32, i32, i32) {
    %c0_i32 = arith.constant 0 : i32
    %c0_i32_0 = arith.constant 0 : i32
    %c0_i32_1 = arith.constant 0 : i32
    return %arg0, %c0_i32, %c0_i32_0 : i32, i32, i32
  }
  func.func @transform_2(%arg0: i32) -> (i32, i32) {
    %c0_i32 = arith.constant 0 : i32
    %c0_i32_0 = arith.constant 0 : i32
    %c0_i32_1 = arith.constant 0 : i32
    return %c0_i32, %c0_i32_0 : i32, i32
  }
  func.func @transform_3(%arg0: i32) -> (i32, i32) {
    %c0_i32 = arith.constant 0 : i32
    %c0_i32_0 = arith.constant 0 : i32
    %c0_i32_1 = arith.constant 0 : i32
    return %c0_i32, %c0_i32_0 : i32, i32
  }
  func.func @transform_4(%arg0: i32) -> (i32, i32) {
    %c0_i32 = arith.constant 0 : i32
    %c0_i32_0 = arith.constant 0 : i32
    %c0_i32_1 = arith.constant 0 : i32
    return %c0_i32, %c0_i32_0 : i32, i32
  }
  func.func @transform_5(%arg0: i32) -> (i32, i32) {
    %c0_i32 = arith.constant 0 : i32
    %c0_i32_0 = arith.constant 0 : i32
    %c0_i32_1 = arith.constant 0 : i32
    return %c0_i32, %c0_i32_0 : i32, i32
  }
  func.func @transform_6(%arg0: i32) -> (i32, i32, i32) {
    %c0_i32 = arith.constant 0 : i32
    %c0_i32_0 = arith.constant 0 : i32
    %c0_i32_1 = arith.constant 0 : i32
    return %arg0, %c0_i32, %c0_i32_0 : i32, i32, i32
  }
}

</mosaic_0001>

<bundles_post_ra>
// kernel: bow_block.1
= control target key start
LH: loop header
LB: loop body
LE: loop exit
PB: predicated region body
PF: predicated region fallthrough
CT: control target
= control target key end

     0   :  { %11 = vsyncpa [#allocation3], 0  ;;  %s707_s0 = inlined_call_operand.vmem [shape: f32[8,8], index: 0, kind: input, shape index: {}]   ;;  %s708_s1 = inlined_call_operand.vmem [shape: f32[2,8,32], index: 1, kind: input, shape index: {}]   ;;  %s709_s2 = inlined_call_operand.vmem [shape: f32[32,64], index: 2, kind: input, shape index: {}]   ;;  %s710_s3 = inlined_call_operand.vmem [shape: f32[1,64], index: 3, kind: input, shape index: {}]   ;;  %s711_s4 = inlined_call_operand.vmem [shape: f32[64,32], index: 4, kind: input, shape index: {}]   ;;  %s712_s5 = inlined_call_operand.vmem [shape: f32[1,32], index: 5, kind: input, shape index: {}]   ;;  %s713_s6 = inlined_call_operand.hbm [shape: f32[2,8,32], index: 6, kind: output, shape index: {}]  }
   0x1   :  { %13 = vsyncpa [#allocation3 + $0x1], 0  ;;  %s575_s21 = smov 0   ;;  %s577_s22 = smov 0  }
   0x2   :  { %s579_s23 = smov 0   ;;  %s581_s24 = smov 0  }
   0x3 LB: > { %s596_s25 = sadd.s32 4294967295, %s538_s24   ;;  %s420_s26 = sadd.s32 4294967294, %s538_s24   ;;  %s538_s24 = sphi %s581_s24, %s719_s24   ;;  %s534_s23 = sphi %s579_s23, %s718_s23   ;;  %s530_s22 = sphi %s577_s22, %s717_s22   ;;  %s526_s21 = sphi %s575_s21, %s716_s21  }
   0x4   : > { %s600_s27 = sadd.s32 1, %s538_s24   ;;  %s157_s28 = sadd.s32 1, %s534_s23 }
   0x5   : > { %s154_s29 = ssub.s32 %s538_s24, %s600_s27  ;;  %p167_p0 = scmp.ne.s32.totalorder %s534_s23, %s530_s22 }
   0x6   : > { %p155_p1 = scmp.eq.s32.totalorder %s154_s29, 0  ;;  %p168_p2 = scmp.eq.s32.totalorder %s596_s25, 1 }
   0x7   : > { %p173_p3 = scmp.ne.s32.totalorder %s530_s22, %s526_s21  ;;  %p174_p4 = scmp.eq.s32.totalorder %s420_s26, 1 }
   0x8   : > { %s611_s30 = scalar_select %p155_p1, %s534_s23, %s157_s28  }
   0x9   : > { %p613_p5 = por %p168_p2, %p167_p0  ;;  %p617_p6 = por %p174_p4, %p173_p3 }
   0xa   : > { %p423_p7 = scmp.ge.s32.totalorder %s538_s24, 1  ;;  %p214_p8 = scmp.lt.s32.totalorder %s538_s24, 3 }
   0xc   : > { %p215_p9 = pnand %p423_p7, %p214_p8 }
   0xd   : > { %p243_p10 = scmp.lt.s32.totalorder (!%p215_p9), %s596_s25, 1  ;;  %s240_s12 = sand.u32 (!%p215_p9), 1, %s530_s22  }
   0xe   : > { %218 = sbr.rel (%p215_p9) target bundleno = 427 (0x1ab), region = 44 }
  0x13   : > { %v277_v0 = vld [vmem:[%s709_s2 + $0x18] sm:$0xff]  ;;  %v276_v1 = vld [vmem:[%s709_s2 + $0x10] sm:$0xff]  ;;  %s244_s13 = scalar_select %p243_p10, %s596_s25, 1  ;;  %v248_v2 = vld [vmem:[%s707_s0] sm:$0xff]  ;;  %vm249_vm0 = vcmask 64512   ;;  %vm282_vm1 = vcmask 261120  }
  0x14   : > { %298 = vmatpush.msra.mxu1 %v277_v0  ;;  %v275_v4 = vld [vmem:[%s709_s2 + $0x8] sm:$0xff]  ;;  %v274_v5 = vld [vmem:[%s709_s2] sm:$0xff]  ;;  %v314_v6 = vld [vmem:[%s711_s4 + $0x38] sm:$0xff]  ;;  %vm319_vm2 = vcmask 523264  }
  0x15   : > { %s425_s14 = sshll.u32 %s244_s13, 3  ;;  %v313_v7 = vld [vmem:[%s711_s4 + $0x30] sm:$0xff]  ;;  %331 = vmatpush.msra.mxu2 %v314_v6  ;;  %v312_v8 = vld [vmem:[%s711_s4 + $0x28] sm:$0xff]  ;;  %v311_v11 = vld [vmem:[%s711_s4 + $0x20] sm:$0xff]  ;;  %s424_s13 = sshll.u32 %s240_s12, 3 }
  0x16   : > { %299 = vmatpush.msra.mxu1 %v276_v1  ;;  %s246_s17 = scalar_lea.vmem %s708_s1, %s425_s14  ;;  %v310_v12 = vld [vmem:[%s711_s4 + $0x18] sm:$0xff]  ;;  %v309_v13 = vld [vmem:[%s711_s4 + $0x10] sm:$0xff]  ;;  %v308_v14 = vld [vmem:[%s711_s4 + $0x8] sm:$0xff]  ;;  %s430_s14 = sshll.u32 %s596_s25, 3 }
  0x17   : > { %v247_v3 = vld [vmem:[%s246_s17] sm:$0xff]  ;;  %332 = vmatpush.msra.mxu2 %v313_v7  ;;  %s356_s19 = scalar_lea.hbm %s713_s6, %s430_s14  ;;  %s242_s20 = scalar_lea.vmem [#allocation2], %s424_s13 }
  0x18   : > { %268 = vmatpush.msra.mxu0 %v247_v3  ;;  %300 = vmatpush.msra.mxu1 %v275_v4  ;;  %v307_v15 = vld [vmem:[%s711_s4] sm:$0xff]  ;;  %s358_s26 = sshll.u32 %s242_s20, 4  ;;  %s360_s28 = sshll.u32 %s356_s19, 4  ;;  %s359_s26 = int_to_ptr.vmem [resolvable:$true] %s358_s26  ;;  %s361_s28 = int_to_ptr.hbm [resolvable:$true] %s360_s28 }
  0x19   : > { %426 = vmatmul.msk.f32.vlgmr.msra.gmra.mxu0 %vm249_vm0, %v248_v2  ;;  %333 = vmatpush.msra.mxu2 %v312_v8  ;;  %v472_v16 = vld [vmem:[%s710_s3] ss:$0 sm:$0xff]  ;;  %s346_s25 = scalar_lea.sflag [#allocation3], %s240_s12  ;;  %s490_s29 = sshra.s32 %s361_s28, 4  ;;  %s491_s29 = int_to_ptr.hbm [resolvable:$true] %s490_s29 }
  0x1a   : > { %301 = vmatpush.msra.mxu1 %v274_v5  ;;  %v473_v20 = vld [vmem:[%s712_s5] ss:$0 sm:$0xff]  ;;  %s492_s9 = scalar_lea.hbm %s491_s29, 8  ;;  %s496_s13 = scalar_lea.hbm %s713_s6, 16 }
  0x1b   : > { %334 = vmatpush.msra.mxu2 %v311_v11  ;;  %p493_p11 = scmp.ne.s32.totalorder %s491_s29, %s492_s9  ;;  %p497_p0 = scmp.lt.s32.totalorder %s491_s29, %s713_s6 }
  0x1c   : > { %p498_p1 = scmp.lt.s32.totalorder %s496_s13, %s492_s9 }
  0x1d   : > { %335 = vmatpush.msra.mxu2 %v310_v12  ;;  %p494_p12 = pnand %p493_p11, %p613_p5 }
  0x1e   : > { %p499_p2 = por %p498_p1, %p497_p0 }
  0x1f   : > { %336 = vmatpush.msra.mxu2 %v309_v13  ;;  %p495_p13 = pneg %p494_p12 }
  0x21   : > { %337 = vmatpush.msra.mxu2 %v308_v14  ;;  %p500_p3 = pnand %p499_p2, %p495_p13 }
  0x23   : > { %338 = vmatpush.msra.mxu2 %v307_v15 }
  0x96   : > { %v270_v9 = vpop.f32.mrf.mxu0 }
  0x97   : > { %v273_v10 = vadd.f32 %v270_v9, %v247_v3 }
  0x99   : > { %427 = vmatmul.msk.f32.vlgmr.msra.gmra.mxu1 %vm282_vm1, %v273_v10 }
 0x116   : > { %v303_v17 = vpop.f32.mrf.mxu1 }
 0x117   : > { %v304_v18 = vadd.f32 %v472_v16, %v303_v17 }
 0x119   : > { %474 = vtanh.f32 %v304_v18 }
 0x11f   : > { %v475_v19 = vpop.eup %474 }
 0x120   : > { %428 = vmatmul.msk.f32.vlgmr.msra.gmra.mxu2 %vm319_vm2, %v475_v19 }
 0x1a3   : > { %v340_v21 = vpop.f32.mrf.mxu2 }
 0x1a4   : > { %v341_v22 = vadd.f32 %v473_v20, %v340_v21 }
 0x1a6   : > { %v343_v23 = vadd.f32 %v341_v22, %v273_v10 }
 0x1a8   : > { %344 = vst.msk [vmem:[%s242_s20] sm:$0xff] %vm282_vm1, %v343_v23 }
 0x1a9   : > { %503 = shalt.err (!%p500_p3)
}
 0x1aa   : > { %433 = dma.vmem_to_hbm [thread:$0]  (%p613_p5), %s359_s26, 128, %s361_s28, %s346_s25  }
 0x1ab PF: > { %p439_p4 = scmp.ge.s32.totalorder %s538_s24, 2  ;;  %s372_s12 = sand.u32 1, %s526_s21  }
 0x1ac   : > { %s373_s16 = scalar_lea.sflag [#allocation3], %s372_s12 }
 0x1ad   : > { %p436_p7 = pnand %p439_p4, %p617_p6 }
 0x1af   : > { %p437_p8 = pneg %p436_p7 }
 0x1b1   : > { %521 = dma.done.wait (%p437_p8), %s373_s16, 128  }
 0x1b2   : > { %523 = vsyncadd (%p437_p8), %s373_s16, 4294967168  ;;  %p16_p9 = scmp.ge.s32.totalorder %s600_s27, 4   ;;  %s716_s21 = smov %s530_s22 }
 0x1b3   : > { %s717_s22 = smov %s534_s23  ;;  %s718_s23 = smov %s611_s30 }
 0x1b4   : > { %s719_s24 = smov %s600_s27  ;;  %18 = sbr.rel (!%p16_p9) target bundleno = 3 (0x3), region = 79 }
 0x1b9   :  { %379 = vsyncpa [#allocation3], 1 }
 0x1ba   :  { %381 = vsyncpa [#allocation3 + $0x1], 1 }

</bundles_post_ra>
